<compile_context>
chip_gen: v7x
topology: tpu7x:2x2x1
jax: 0.10.0
libtpu: 0.0.40
codegen_flags: <defaults>
</compile_context>

<pallas_src>
import functools

import jax
import jax.numpy as jnp
from jax.experimental import pallas as pl
from jax.experimental.pallas import tpu as pltpu


# ---------------------------------------------------------------------------
# Fused path: y lives entirely in a VMEM scratch (no HBM round trip of y).
# grid = (2, num_tiles); phase 0 computes y + stats, phase 1 normalizes.
# ---------------------------------------------------------------------------
def _fused_kernel(x_ref, w1_ref, w2_ref, p_ref, o_ref, y_vmem, ss_vmem, *,
                  n_rows, eps, tile_n, compute_dtype):
    phase = pl.program_id(0)
    j = pl.program_id(1)
    num_tiles = pl.num_programs(1)
    row0 = pl.multiple_of(j * tile_n, tile_n)

    @pl.when(phase == 0)
    def _():
        x = x_ref[...].astype(jnp.float32)                    # (TN, H) f32
        b1 = p_ref[0:1, :]
        b2 = p_ref[1:2, :]

        # block(x): Linear -> ReLU -> Linear.  MXU in bf16, f32 accumulation.
        h = jnp.dot(x.astype(compute_dtype), w1_ref[...],
                    preferred_element_type=jnp.float32) + b1
        h = jnp.maximum(h, 0.0)
        h = jnp.dot(h.astype(compute_dtype), w2_ref[...],
                    preferred_element_type=jnp.float32) + b2

        y = x + h                                             # residual, f32
        y_vmem[pl.ds(row0, tile_n), :] = y

        part_sum = jnp.sum(y, axis=0, keepdims=True)          # (1, H)
        part_sq = jnp.sum(y * y, axis=0, keepdims=True)       # (1, H)

        @pl.when(j == 0)
        def _():
            ss_vmem[0:1, :] = part_sum
            ss_vmem[1:2, :] = part_sq

        @pl.when(j != 0)
        def _():
            ss_vmem[0:1, :] = ss_vmem[0:1, :] + part_sum
            ss_vmem[1:2, :] = ss_vmem[1:2, :] + part_sq

        # Last tile of phase 0: fold BN into per-feature scale/shift in place.
        @pl.when(j == num_tiles - 1)
        def _():
            inv_n = 1.0 / n_rows
            mean = ss_vmem[0:1, :] * inv_n
            var = ss_vmem[1:2, :] * inv_n - mean * mean       # biased variance
            scale = p_ref[2:3, :] * jax.lax.rsqrt(var + eps)  # gamma/std
            shift = p_ref[3:4, :] - mean * scale              # beta - mean*s
            ss_vmem[0:1, :] = scale
            ss_vmem[1:2, :] = shift

    @pl.when(phase == 1)
    def _():
        y = y_vmem[pl.ds(row0, tile_n), :]
        o_ref[...] = (y * ss_vmem[0:1, :] + ss_vmem[1:2, :]).astype(o_ref.dtype)


def _residual_block_fused(x, w1c, w2c, params, *, tile_n, eps, compute_dtype):
    N, H = x.shape
    num_tiles = N // tile_n

    x_spec = pl.BlockSpec((tile_n, H), lambda p, j: (j * (1 - p), 0))
    o_spec = pl.BlockSpec((tile_n, H), lambda p, j: (j * p, 0))
    w_spec = pl.BlockSpec((H, H), lambda p, j: (0, 0))         # resident
    p_spec = pl.BlockSpec((4, H), lambda p, j: (0, 0))         # resident

    return pl.pallas_call(
        functools.partial(_fused_kernel, n_rows=float(N), eps=eps,
                          tile_n=tile_n, compute_dtype=compute_dtype),
        grid=(2, num_tiles),
        in_specs=[x_spec, w_spec, w_spec, p_spec],
        out_specs=o_spec,
        out_shape=jax.ShapeDtypeStruct((N, H), x.dtype),
        scratch_shapes=[pltpu.VMEM((N, H), jnp.float32),       # resident y
                        pltpu.VMEM((2, H), jnp.float32)],      # stats/scale
        compiler_params=pltpu.CompilerParams(
            dimension_semantics=("arbitrary", "arbitrary"),
            vmem_limit_bytes=32 * 1024 * 1024),
    )(x, w1c, w2c, params)


# ---------------------------------------------------------------------------
# Two-pass path (large N): bf16 y round trip through HBM + folded BN apply.
# ---------------------------------------------------------------------------
def _block_and_stats_kernel(x_ref, w1_ref, w2_ref, p_ref, y_ref, stats_ref, *,
                            n_rows, eps, compute_dtype):
    """Pass 1: y = x + MLP(x) (stored bf16); accumulate per-feature sum /
    sum-of-squares of the bf16-rounded y; fold BN into (scale, shift) at the
    last grid step."""
    i = pl.program_id(0)
    num_tiles = pl.num_programs(0)

    x = x_ref[...].astype(jnp.float32)                        # (TN, H) f32
    b1 = p_ref[0:1, :]
    b2 = p_ref[1:2, :]

    h = jnp.dot(x.astype(compute_dtype), w1_ref[...],
                preferred_element_type=jnp.float32) + b1
    h = jnp.maximum(h, 0.0)
    h = jnp.dot(h.astype(compute_dtype), w2_ref[...],
                preferred_element_type=jnp.float32) + b2

    y_b = (x + h).astype(y_ref.dtype)                         # bf16 rounding
    y_ref[...] = y_b
    yq = y_b.astype(jnp.float32)                              # stats match y

    part_sum = jnp.sum(yq, axis=0, keepdims=True)
    part_sq = jnp.sum(yq * yq, axis=0, keepdims=True)

    @pl.when(i == 0)
    def _():
        stats_ref[0:1, :] = part_sum
        stats_ref[1:2, :] = part_sq

    @pl.when(i != 0)
    def _():
        stats_ref[0:1, :] = stats_ref[0:1, :] + part_sum
        stats_ref[1:2, :] = stats_ref[1:2, :] + part_sq

    @pl.when(i == num_tiles - 1)
    def _():
        inv_n = 1.0 / n_rows
        mean = stats_ref[0:1, :] * inv_n
        var = stats_ref[1:2, :] * inv_n - mean * mean         # biased variance
        scale = p_ref[2:3, :] * jax.lax.rsqrt(var + eps)
        shift = p_ref[3:4, :] - mean * scale
        stats_ref[0:1, :] = scale
        stats_ref[1:2, :] = shift


def _bn_apply_kernel(y_ref, ss_ref, o_ref):
    """Pass 2: o = y * scale + shift for one (TILE_N, H) tile."""
    y = y_ref[...].astype(jnp.float32)
    o_ref[...] = (y * ss_ref[0:1, :] + ss_ref[1:2, :]).astype(o_ref.dtype)


def _residual_block_two_pass(x, w1c, w2c, params, *, tile_n, eps,
                             compute_dtype):
    N, H = x.shape
    num_tiles = N // tile_n

    row_spec = pl.BlockSpec((tile_n, H), lambda i: (i, 0))     # batch tiles
    w_spec = pl.BlockSpec((H, H), lambda i: (0, 0))            # resident
    p_spec = pl.BlockSpec((4, H), lambda i: (0, 0))            # resident
    stats_spec = pl.BlockSpec((2, H), lambda i: (0, 0))        # accumulator

    cparams = functools.partial(
        pltpu.CompilerParams, vmem_limit_bytes=32 * 1024 * 1024)

    # Pass 1: residual MLP + fused sum/sum_sq accumulation + BN fold.  The
    # stats output is resident across the batch axis -> that axis is serial.
    y, scale_shift = pl.pallas_call(
        functools.partial(_block_and_stats_kernel, n_rows=float(N), eps=eps,
                          compute_dtype=compute_dtype),
        grid=(num_tiles,),
        in_specs=[row_spec, w_spec, w_spec, p_spec],
        out_specs=(row_spec, stats_spec),
        out_shape=(jax.ShapeDtypeStruct((N, H), jnp.bfloat16),  # bf16 y
                   jax.ShapeDtypeStruct((2, H), jnp.float32)),
        compiler_params=cparams(dimension_semantics=("arbitrary",)),
    )(x, w1c, w2c, params)

    # Pass 2: apply folded BN.  Tiles independent -> "parallel".
    out = pl.pallas_call(
        _bn_apply_kernel,
        grid=(num_tiles,),
        in_specs=[row_spec, stats_spec],
        out_specs=row_spec,
        out_shape=jax.ShapeDtypeStruct((N, H), x.dtype),
        compiler_params=cparams(dimension_semantics=("parallel",)),
    )(y, scale_shift)
    return out


# ---------------------------------------------------------------------------
# Dispatch wrapper.
# ---------------------------------------------------------------------------
def _pick_tile(n):
    for t in (512, 256, 128, 64, 32, 16):
        if n % t == 0:
            return t
    raise ValueError(f"batch size {n} must be a multiple of 16")


def residual_block(x, w1, b1, w2, b2, gamma, beta, *, tile_n=None, eps=1e-5,
                   compute_dtype=jnp.bfloat16, force_two_pass=False):
    """x: (N, H) f32.  w1/w2 are (in, out) (PyTorch weights pre-transposed)."""
    N, H = x.shape
    assert H % 128 == 0, "feature axis must be lane-dense (multiple of 128)"
    if tile_n is None:
        tile_n = _pick_tile(N)
    assert N % tile_n == 0 and tile_n % 16 == 0

    # Pack the four (1, H) vectors into a single (4, H) input (one small DMA).
    params = jnp.concatenate([b1, b2, gamma, beta], axis=0).astype(jnp.float32)
    w1c = w1.astype(compute_dtype)
    w2c = w2.astype(compute_dtype)

    # Fused path whenever the f32 intermediate y fits comfortably in VMEM
    # (budgeted against v7x's 64 MiB physical / 32 MiB scoped default).
    fused_ok = (N * H * 4) <= 12 * 1024 * 1024
    if fused_ok and not force_two_pass:
        return _residual_block_fused(x, w1c, w2c, params, tile_n=tile_n,
                                     eps=eps, compute_dtype=compute_dtype)
    return _residual_block_two_pass(x, w1c, w2c, params, tile_n=tile_n,
                                    eps=eps, compute_dtype=compute_dtype)


def reference(x, w1, b1, w2, b2, gamma, beta, eps=1e-5):
    h = jnp.maximum(x @ w1 + b1, 0.0) @ w2 + b2
    y = x + h
    mean = y.mean(axis=0, keepdims=True)
    var = ((y - mean) ** 2).mean(axis=0, keepdims=True)
    return gamma * (y - mean) / jnp.sqrt(var + eps) + beta


if __name__ == "__main__":
    N, H = 512, 128          # batch tiled into 4 x (128, 128) row blocks
    TILE_N = 128

    key = jax.random.PRNGKey(0)
    kx, k1, k2, k3, k4 = jax.random.split(key, 5)

    # Quantize inputs to bf16-representable f32 so the bf16-fed MXU path and
    # the f32 reference agree tightly (purely a test-harness choice).
    def q(a):
        return a.astype(jnp.bfloat16).astype(jnp.float32)

    x = q(jax.random.normal(kx, (N, H), dtype=jnp.float32))

    # PyTorch Linear stores weight as (out, in); pre-transpose to (in, out)
    # so the kernel does x @ W directly (layout glue only, no compute).
    bound = 1.0 / jnp.sqrt(H)
    w1 = q(jax.random.uniform(k1, (H, H), jnp.float32, -bound, bound))
    b1 = q(jax.random.uniform(k2, (1, H), jnp.float32, -bound, bound))
    w2 = q(jax.random.uniform(k3, (H, H), jnp.float32, -bound, bound))
    b2 = q(jax.random.uniform(k4, (1, H), jnp.float32, -bound, bound))

    # BatchNorm1d affine params (default init: gamma=1, beta=0).
    gamma = jnp.ones((1, H), jnp.float32)
    beta = jnp.zeros((1, H), jnp.float32)

    ref = reference(x, w1, b1, w2, b2, gamma, beta)

    # Fused (VMEM-resident y) path.
    out_fused = residual_block(x, w1, b1, w2, b2, gamma, beta, tile_n=TILE_N)
    out_fused = jax.block_until_ready(out_fused)
    assert out_fused.shape == (N, H)
    assert jnp.allclose(out_fused, ref, atol=2e-3, rtol=2e-3), \
        "fused path mismatch vs reference"

    # Two-pass (bf16 y through HBM) path, used automatically at large N.
    out_2p = residual_block(x, w1, b1, w2, b2, gamma, beta, tile_n=TILE_N,
                            force_two_pass=True)
    out_2p = jax.block_until_ready(out_2p)
    assert out_2p.shape == (N, H)
    assert jnp.allclose(out_2p, ref, atol=3e-2, rtol=3e-2), \
        "two-pass path mismatch vs reference"

    print("KERNEL_OK")
</pallas_src>

<mosaic_0001>
module attributes {stable_mosaic.version = 11 : i64} {
  func.func @_fused_kernel(%arg0: i32, %arg1: i32, %arg2: memref<128x128xf32, #tpu.memory_space<vmem>>, %arg3: memref<128x128xbf16, #tpu.memory_space<vmem>>, %arg4: memref<128x128xbf16, #tpu.memory_space<vmem>>, %arg5: memref<4x128xf32, #tpu.memory_space<vmem>>, %arg6: memref<128x128xf32, #tpu.memory_space<vmem>>, %arg7: memref<512x128xf32, #tpu.memory_space<vmem>>, %arg8: memref<2x128xf32, #tpu.memory_space<vmem>>) attributes {dimension_semantics = [#tpu.dimension_semantics<arbitrary>, #tpu.dimension_semantics<arbitrary>], iteration_bounds = array<i64: 2, 4>, scalar_prefetch = 0 : i64, scratch_operands = 2 : i64, tpu.core_type = #tpu.core_type<tc>, window_params = [{transform_indices = @transform_0, window_bounds = array<i64: 128, 128>}, {pipeline_mode = #tpu.pipeline_mode<synchronous>, transform_indices = @transform_1, window_bounds = array<i64: 128, 128>}, {pipeline_mode = #tpu.pipeline_mode<synchronous>, transform_indices = @transform_2, window_bounds = array<i64: 128, 128>}, {pipeline_mode = #tpu.pipeline_mode<synchronous>, transform_indices = @transform_3, window_bounds = array<i64: 4, 128>}, {transform_indices = @transform_4, window_bounds = array<i64: 128, 128>}]} {
    %c128_i32 = arith.constant 128 : i32
    %0 = arith.muli %arg1, %c128_i32 : i32
    %1 = tpu.assume_multiple %0, 128 : i32
    %c0_i32 = arith.constant 0 : i32
    %2 = arith.cmpi eq, %arg0, %c0_i32 : i32
    %3 = arith.extui %2 : i1 to i32
    %c0_i32_0 = arith.constant 0 : i32
    %4 = arith.cmpi ne, %3, %c0_i32_0 : i32
    scf.if %4 {
      %c0 = arith.constant 0 : index
      %c0_2 = arith.constant 0 : index
      %8 = vector.load %arg2[%c0, %c0_2] : memref<128x128xf32, #tpu.memory_space<vmem>>, vector<128x128xf32>
      %c0_3 = arith.constant 0 : index
      %c0_4 = arith.constant 0 : index
      %9 = vector.load %arg5[%c0_3, %c0_4] : memref<4x128xf32, #tpu.memory_space<vmem>>, vector<1x128xf32>
      %c1 = arith.constant 1 : index
      %c0_5 = arith.constant 0 : index
      %10 = vector.load %arg5[%c1, %c0_5] : memref<4x128xf32, #tpu.memory_space<vmem>>, vector<1x128xf32>
      %11 = arith.truncf %8 : vector<128x128xf32> to vector<128x128xbf16>
      %c0_6 = arith.constant 0 : index
      %c0_7 = arith.constant 0 : index
      %12 = vector.load %arg3[%c0_6, %c0_7] : memref<128x128xbf16, #tpu.memory_space<vmem>>, vector<128x128xbf16>
      %cst = arith.constant dense<0.000000e+00> : vector<128x128xf32>
      %13 = tpu.matmul %11, %12, %cst {dimension_numbers = #tpu.dot_dimension_numbers<[1], [0], [0], [1], [0, 0, 1, 1], [], []>} : vector<128x128xbf16>, vector<128x128xbf16>, vector<128x128xf32> -> vector<128x128xf32>
      %14 = vector.broadcast %9 : vector<1x128xf32> to vector<128x128xf32>
      %15 = arith.addf %13, %14 : vector<128x128xf32>
      %cst_8 = arith.constant 0.000000e+00 : f32
      %16 = vector.broadcast %cst_8 : f32 to vector<128x128xf32>
      %17 = arith.maximumf %15, %16 : vector<128x128xf32>
      %18 = arith.truncf %17 : vector<128x128xf32> to vector<128x128xbf16>
      %c0_9 = arith.constant 0 : index
      %c0_10 = arith.constant 0 : index
      %19 = vector.load %arg4[%c0_9, %c0_10] : memref<128x128xbf16, #tpu.memory_space<vmem>>, vector<128x128xbf16>
      %cst_11 = arith.constant dense<0.000000e+00> : vector<128x128xf32>
      %20 = tpu.matmul %18, %19, %cst_11 {dimension_numbers = #tpu.dot_dimension_numbers<[1], [0], [0], [1], [0, 0, 1, 1], [], []>} : vector<128x128xbf16>, vector<128x128xbf16>, vector<128x128xf32> -> vector<128x128xf32>
      %21 = vector.broadcast %10 : vector<1x128xf32> to vector<128x128xf32>
      %22 = arith.addf %20, %21 : vector<128x128xf32>
      %23 = arith.addf %8, %22 : vector<128x128xf32>
      %24 = arith.index_cast %1 : i32 to index
      %c0_12 = arith.constant 0 : index
      %25 = vector.load %arg7[%24, %c0_12] : memref<512x128xf32, #tpu.memory_space<vmem>>, vector<128x128xf32>
      tpu.vector_store %arg7[%24, %c0_12], %23 {strides = array<i32>} : memref<512x128xf32, #tpu.memory_space<vmem>>, vector<128x128xf32>,
      %cst_13 = arith.constant dense<0.000000e+00> : vector<128xf32>
      %26 = vector.multi_reduction <add>, %23, %cst_13 [0] : vector<128x128xf32> to vector<128xf32>
      %27 = vector.shape_cast %26 : vector<128xf32> to vector<1x128xf32>
      %28 = arith.mulf %23, %23 : vector<128x128xf32>
      %cst_14 = arith.constant dense<0.000000e+00> : vector<128xf32>
      %29 = vector.multi_reduction <add>, %28, %cst_14 [0] : vector<128x128xf32> to vector<128xf32>
      %30 = vector.shape_cast %29 : vector<128xf32> to vector<1x128xf32>
      %c0_i32_15 = arith.constant 0 : i32
      %31 = arith.cmpi eq, %arg1, %c0_i32_15 : i32
      %32 = arith.extui %31 : i1 to i32
      %c0_i32_16 = arith.constant 0 : i32
      %33 = arith.cmpi ne, %32, %c0_i32_16 : i32
      scf.if %33 {
        %c0_20 = arith.constant 0 : index
        %c0_21 = arith.constant 0 : index
        %40 = vector.load %arg8[%c0_20, %c0_21] : memref<2x128xf32, #tpu.memory_space<vmem>>, vector<1x128xf32>
        tpu.vector_store %arg8[%c0_20, %c0_21], %27 {strides = array<i32>} : memref<2x128xf32, #tpu.memory_space<vmem>>, vector<1x128xf32>,
        %c1_22 = arith.constant 1 : index
        %c0_23 = arith.constant 0 : index
        %41 = vector.load %arg8[%c1_22, %c0_23] : memref<2x128xf32, #tpu.memory_space<vmem>>, vector<1x128xf32>
        tpu.vector_store %arg8[%c1_22, %c0_23], %30 {strides = array<i32>} : memref<2x128xf32, #tpu.memory_space<vmem>>, vector<1x128xf32>,
      } else {
      }
      %c0_i32_17 = arith.constant 0 : i32
      %34 = arith.cmpi ne, %arg1, %c0_i32_17 : i32
      %35 = arith.extui %34 : i1 to i32
      %c0_i32_18 = arith.constant 0 : i32
      %36 = arith.cmpi ne, %35, %c0_i32_18 : i32
      scf.if %36 {
        %c0_20 = arith.constant 0 : index
        %c0_21 = arith.constant 0 : index
        %40 = vector.load %arg8[%c0_20, %c0_21] : memref<2x128xf32, #tpu.memory_space<vmem>>, vector<1x128xf32>
        %41 = arith.addf %40, %27 : vector<1x128xf32>
        %c0_22 = arith.constant 0 : index
        %c0_23 = arith.constant 0 : index
        %42 = vector.load %arg8[%c0_22, %c0_23] : memref<2x128xf32, #tpu.memory_space<vmem>>, vector<1x128xf32>
        tpu.vector_store %arg8[%c0_22, %c0_23], %41 {strides = array<i32>} : memref<2x128xf32, #tpu.memory_space<vmem>>, vector<1x128xf32>,
        %c1_24 = arith.constant 1 : index
        %c0_25 = arith.constant 0 : index
        %43 = vector.load %arg8[%c1_24, %c0_25] : memref<2x128xf32, #tpu.memory_space<vmem>>, vector<1x128xf32>
        %44 = arith.addf %43, %30 : vector<1x128xf32>
        %c1_26 = arith.constant 1 : index
        %c0_27 = arith.constant 0 : index
        %45 = vector.load %arg8[%c1_26, %c0_27] : memref<2x128xf32, #tpu.memory_space<vmem>>, vector<1x128xf32>
        tpu.vector_store %arg8[%c1_26, %c0_27], %44 {strides = array<i32>} : memref<2x128xf32, #tpu.memory_space<vmem>>, vector<1x128xf32>,
      } else {
      }
      %c3_i32 = arith.constant 3 : i32
      %37 = arith.cmpi eq, %arg1, %c3_i32 : i32
      %38 = arith.extui %37 : i1 to i32
      %c0_i32_19 = arith.constant 0 : i32
      %39 = arith.cmpi ne, %38, %c0_i32_19 : i32
      scf.if %39 {
        %c0_20 = arith.constant 0 : index
        %c0_21 = arith.constant 0 : index
        %40 = vector.load %arg8[%c0_20, %c0_21] : memref<2x128xf32, #tpu.memory_space<vmem>>, vector<1x128xf32>
        %cst_22 = arith.constant 0.001953125 : f32
        %41 = vector.broadcast %cst_22 : f32 to vector<1x128xf32>
        %42 = arith.mulf %40, %41 : vector<1x128xf32>
        %c1_23 = arith.constant 1 : index
        %c0_24 = arith.constant 0 : index
        %43 = vector.load %arg8[%c1_23, %c0_24] : memref<2x128xf32, #tpu.memory_space<vmem>>, vector<1x128xf32>
        %cst_25 = arith.constant 0.001953125 : f32
        %44 = vector.broadcast %cst_25 : f32 to vector<1x128xf32>
        %45 = arith.mulf %43, %44 : vector<1x128xf32>
        %46 = arith.mulf %42, %42 : vector<1x128xf32>
        %47 = arith.subf %45, %46 : vector<1x128xf32>
        %c2 = arith.constant 2 : index
        %c0_26 = arith.constant 0 : index
        %48 = vector.load %arg5[%c2, %c0_26] : memref<4x128xf32, #tpu.memory_space<vmem>>, vector<1x128xf32>
        %cst_27 = arith.constant 9.99999974E-6 : f32
        %49 = vector.broadcast %cst_27 : f32 to vector<1x128xf32>
        %50 = arith.addf %47, %49 : vector<1x128xf32>
        %51 = math.rsqrt %50 : vector<1x128xf32>
        %52 = arith.mulf %48, %51 : vector<1x128xf32>
        %c3 = arith.constant 3 : index
        %c0_28 = arith.constant 0 : index
        %53 = vector.load %arg5[%c3, %c0_28] : memref<4x128xf32, #tpu.memory_space<vmem>>, vector<1x128xf32>
        %54 = arith.mulf %42, %52 : vector<1x128xf32>
        %55 = arith.subf %53, %54 : vector<1x128xf32>
        %c0_29 = arith.constant 0 : index
        %c0_30 = arith.constant 0 : index
        %56 = vector.load %arg8[%c0_29, %c0_30] : memref<2x128xf32, #tpu.memory_space<vmem>>, vector<1x128xf32>
        tpu.vector_store %arg8[%c0_29, %c0_30], %52 {strides = array<i32>} : memref<2x128xf32, #tpu.memory_space<vmem>>, vector<1x128xf32>,
        %c1_31 = arith.constant 1 : index
        %c0_32 = arith.constant 0 : index
        %57 = vector.load %arg8[%c1_31, %c0_32] : memref<2x128xf32, #tpu.memory_space<vmem>>, vector<1x128xf32>
        tpu.vector_store %arg8[%c1_31, %c0_32], %55 {strides = array<i32>} : memref<2x128xf32, #tpu.memory_space<vmem>>, vector<1x128xf32>,
      } else {
      }
    } else {
    }
    %c1_i32 = arith.constant 1 : i32
    %5 = arith.cmpi eq, %arg0, %c1_i32 : i32
    %6 = arith.extui %5 : i1 to i32
    %c0_i32_1 = arith.constant 0 : i32
    %7 = arith.cmpi ne, %6, %c0_i32_1 : i32
    scf.if %7 {
      %8 = arith.index_cast %1 : i32 to index
      %c0 = arith.constant 0 : index
      %9 = vector.load %arg7[%8, %c0] : memref<512x128xf32, #tpu.memory_space<vmem>>, vector<128x128xf32>
      %c0_2 = arith.constant 0 : index
      %c0_3 = arith.constant 0 : index
      %10 = vector.load %arg8[%c0_2, %c0_3] : memref<2x128xf32, #tpu.memory_space<vmem>>, vector<1x128xf32>
      %11 = vector.broadcast %10 : vector<1x128xf32> to vector<128x128xf32>
      %12 = arith.mulf %9, %11 : vector<128x128xf32>
      %c1 = arith.constant 1 : index
      %c0_4 = arith.constant 0 : index
      %13 = vector.load %arg8[%c1, %c0_4] : memref<2x128xf32, #tpu.memory_space<vmem>>, vector<1x128xf32>
      %14 = vector.broadcast %13 : vector<1x128xf32> to vector<128x128xf32>
      %15 = arith.addf %12, %14 : vector<128x128xf32>
      %c0_5 = arith.constant 0 : index
      %c0_6 = arith.constant 0 : index
      %16 = vector.load %arg6[%c0_5, %c0_6] : memref<128x128xf32, #tpu.memory_space<vmem>>, vector<128x128xf32>
      tpu.vector_store %arg6[%c0_5, %c0_6], %15 {strides = array<i32>} : memref<128x128xf32, #tpu.memory_space<vmem>>, vector<128x128xf32>,
    } else {
    }
    return
  }
  func.func @transform_0(%arg0: i32, %arg1: i32) -> (i32, i32) {
    %c1_i32 = arith.constant 1 : i32
    %0 = arith.subi %c1_i32, %arg0 : i32
    %1 = arith.muli %arg1, %0 : i32
    %c0_i32 = arith.constant 0 : i32
    %c0_i32_0 = arith.constant 0 : i32
    return %1, %c0_i32 : i32, i32
  }
  func.func @transform_1(%arg0: i32, %arg1: i32) -> (i32, i32) {
    %c0_i32 = arith.constant 0 : i32
    %c0_i32_0 = arith.constant 0 : i32
    %c0_i32_1 = arith.constant 0 : i32
    return %c0_i32, %c0_i32_0 : i32, i32
  }
  func.func @transform_2(%arg0: i32, %arg1: i32) -> (i32, i32) {
    %c0_i32 = arith.constant 0 : i32
    %c0_i32_0 = arith.constant 0 : i32
    %c0_i32_1 = arith.constant 0 : i32
    return %c0_i32, %c0_i32_0 : i32, i32
  }
  func.func @transform_3(%arg0: i32, %arg1: i32) -> (i32, i32) {
    %c0_i32 = arith.constant 0 : i32
    %c0_i32_0 = arith.constant 0 : i32
    %c0_i32_1 = arith.constant 0 : i32
    return %c0_i32, %c0_i32_0 : i32, i32
  }
  func.func @transform_4(%arg0: i32, %arg1: i32) -> (i32, i32) {
    %0 = arith.muli %arg1, %arg0 : i32
    %c0_i32 = arith.constant 0 : i32
    %c0_i32_0 = arith.constant 0 : i32
    return %0, %c0_i32 : i32, i32
  }
}

</mosaic_0001>

<bundles_post_ra>
// kernel: tpu_custom_call.1
= control target key start
LH: loop header
LB: loop body
LE: loop exit
PB: predicated region body
PF: predicated region fallthrough
CT: control target
= control target key end

     0   :  { %s2021_s0 = inlined_call_operand.hbm [shape: f32[512,128], index: 0, kind: input, shape index: {}]   ;;  %s2022_s1 = inlined_call_operand.hbm [shape: bf16[128,128], index: 1, kind: input, shape index: {}]   ;;  %s2023_s2 = inlined_call_operand.hbm [shape: bf16[128,128], index: 2, kind: input, shape index: {}]   ;;  %s2024_s3 = inlined_call_operand.vmem [shape: f32[4,128], index: 3, kind: input, shape index: {}]   ;;  %s2025_s4 = inlined_call_operand.hbm [shape: f32[512,128], index: 4, kind: output, shape index: {}]  }
   0x1   :  { %2040 = sst [smem:[#allocation19_spill]] %s2022_s1 }
   0x2   :  { %2041 = sst [smem:[#allocation20_spill]] %s2023_s2 }
   0x3   :  { %2042 = sst [smem:[#allocation21_spill]] %s2024_s3 }
   0x4   :  { %2043 = sst [smem:[#allocation22_spill]] %s2025_s4 }
   0x5   :  { %9 = vsyncpa [#allocation5], 0 }
   0x6   :  { %11 = vsyncpa [#allocation5 + $0x1], 0 }
   0x7   :  { %12 = vsyncpa [#allocation8], 0 }
   0x8   :  { %13 = vsyncpa [#allocation6], 0 }
   0x9   :  { %15 = vsyncpa [#allocation6 + $0x1], 0  ;;  %s1522_s15 = smov 0   ;;  %s1524_s16 = smov 0  }
   0xa   :  { %s1526_s17 = smov 0   ;;  %s1528_s18 = smov 0  }
   0xb   :  { %s1530_s19 = smov 0   ;;  %s1532_s20 = smov 0  }
   0xc   :  { %s1534_s21 = smov 0   ;;  %s1536_s22 = smov 0  }
   0xd   :  { %s1538_s23 = smov 0   ;;  %s1540_s24 = smov 0  }
   0xe   :  { %s1542_s25 = smov 0  }
   0xf LB: > { %2044 = sst [smem:[#allocation14_spill]] %s1445_s15  ;;  %s983_s26 = sadd.s32 4294967295, %s1485_s25   ;;  %s1485_s25 = sphi %s1542_s25, %s21_s25   ;;  %s1481_s24 = sphi %s1540_s24, %s2080_s24   ;;  %s1477_s23 = sphi %s1538_s23, %s2079_s23   ;;  %s1473_s22 = sphi %s1536_s22, %s2072_s22   ;;  %s1469_s21 = sphi %s1534_s21, %s2071_s21   ;;  %s1465_s20 = sphi %s1532_s20, %s2078_s20   ;;  %s1461_s19 = sphi %s1530_s19, %s2077_s19   ;;  %s1457_s18 = sphi %s1528_s18, %s2076_s18   ;;  %s1453_s17 = sphi %s1526_s17, %s2075_s17   ;;  %s1449_s16 = sphi %s1524_s16, %s2074_s16   ;;  %s1445_s15 = sphi %s1522_s15, %s2073_s15  }
  0x10   : > { %2045 = sst [smem:[#allocation15_spill]] %s1477_s23  ;;  %s984_s27 = sadd.s32 4294967294, %s1485_s25  }
  0x11   : > { %2046 = sst [smem:[#allocation16_spill]] %s1481_s24  ;;  %p57_p0 = scmp.ne.s32.totalorder %s1461_s19, %s1457_s18 }
  0x12   : > { %p1578_p1 = scmp.eq.s32.totalorder %s983_s26, 0  ;;  %p145_p2 = scmp.ne.s32.totalorder %s1453_s17, %s1449_s16 }
  0x13   : > { %p146_p4 = scmp.eq.s32.totalorder %s983_s26, 7  ;;  %p151_p5 = scmp.ne.s32.totalorder %s1449_s16, %s1445_s15 }
  0x14   : > { %s2047_s28 = scalar_select %p1578_p1, 1, 0 }
  0x15   : > { %p1587_p3 = por %p1578_p1, %p57_p0  ;;  %p152_p6 = scmp.eq.s32.totalorder %s984_s27, 7 }
  0x16   : > { %p1593_p7 = por %p146_p4, %p145_p2  ;;  %p985_p8 = scmp.ge.s32.totalorder %s1485_s25, 1 }
  0x17   : > { %s2048_s30 = scalar_select %p1587_p3, 1, 0 }
  0x18   : > { %s2049_s5 = scalar_select %p1593_p7, 1, 0 }
  0x19   : > { %p1598_p9 = por %p152_p6, %p151_p5  ;;  %p159_p10 = scmp.lt.s32.totalorder %s1485_s25, 9 }
  0x1a   : > { %2050 = sst [smem:[#allocation17_spill]] %s2049_s5  ;;  %s1487_s8 = smov [#allocation7]  }
  0x1b   : > { %s2051_s6 = scalar_select %p1598_p9, 1, 0 }
  0x1c   : > { %p1603_p11 = pnand %p985_p8, %p159_p10  ;;  %s171_s9 = sshll.u32 %s1487_s8, 4  ;;  %s172_s9 = int_to_ptr.vmem [resolvable:$true] %s171_s9 }
  0x1d   : > { %2052 = sst [smem:[#allocation18_spill]] %s2051_s6  ;;  %s1488_s11 = smov [#allocation9]  }
  0x1e   : > { %s2053_s7 = scalar_select %p1603_p11, 1, 0 }
  0x1f   : > { %p1138_p12 = pneg %p1603_p11  ;;  %s184_s12 = sshll.u32 %s1488_s11, 4  ;;  %s1615_s12 = int_to_ptr.vmem [resolvable:$true] %s184_s12 }
  0x20   : > { %s2055_s1 = sld [smem:[#allocation19_spill]] }
  0x21   : > { %p1611_p13 = pnand %p1138_p12, %p1578_p1 }
  0x23   : > { %p1275_p2 = pneg %p1611_p13 }
  0x26   : > { %s1273_s18 = scalar_lea.hbm %s2055_s1, 1024 }
  0x27   : > { %p1274_p0 = scmp.ne.s32.totalorder %s2055_s1, %s1273_s18  ;;  %p1280_p6 = scmp.lt.u32.totalorder %s1273_s18, %s2055_s1 }
  0x29   : > { %p1276_p4 = pnand %p1275_p2, %p1274_p0 }
  0x2b   : > { %p1277_p5 = pneg %p1276_p4 }
  0x2d   : > { %p1282_p8 = pnand %p1280_p6, %p1277_p5 }
  0x2f   : > { %1285 = shalt.err (!%p1282_p8)
}
  0x30   : > { %s1286_s11 = scalar_lea.vmem %s172_s9, 1024  ;;  %p1294_p7 = scmp.lt.s32.totalorder %s172_s9, %s172_s9 }
  0x31   : > { %p1287_p10 = scmp.ne.s32.totalorder %s172_s9, %s1286_s11  ;;  %p1295_p1 = scmp.lt.s32.totalorder %s1286_s11, %s1286_s11 }
  0x33   : > { %p1289_p12 = pnand %p1287_p10, %p1275_p2  ;;  %p1296_p3 = por %p1295_p1, %p1294_p7 }
  0x35   : > { %p1290_p9 = pneg %p1289_p12 }
  0x37   : > { %p1297_p11 = pnand %p1296_p3, %p1290_p9 }
  0x39   : > { %1300 = shalt.err (!%p1297_p11)
}
  0x3a   : > { %s1489_s13 = smov 64   ;;  %s1490_s14 = smov 4  }
  0x3b   : > { %1141 = dma.hbm_to_vmem [thread:$0]  (!%p1611_p13), %s2055_s1, 1024, %s172_s9, [#allocation8], %s1489_s13, %s1489_s13, %s1490_s14  }
  0x3c   : > { %s2056_s2 = sld [smem:[#allocation20_spill]] }
  0x42   : > { %s1301_s8 = scalar_lea.hbm %s2056_s2, 1024 }
  0x43   : > { %p1302_p0 = scmp.ne.s32.totalorder %s2056_s2, %s1301_s8  ;;  %p1308_p7 = scmp.lt.u32.totalorder %s1301_s8, %s2056_s2 }
  0x45   : > { %p1304_p1 = pnand %p1302_p0, %p1275_p2 }
  0x47   : > { %p1305_p3 = pneg %p1304_p1 }
  0x49   : > { %p1310_p9 = pnand %p1308_p7, %p1305_p3 }
  0x4b   : > { %1313 = shalt.err (!%p1310_p9)
}
  0x4c   : > { %s1314_s9 = scalar_lea.vmem %s1615_s12, 1024  ;;  %p1322_p6 = scmp.lt.s32.totalorder %s1615_s12, %s1615_s12 }
  0x4d   : > { %p1315_p11 = scmp.ne.s32.totalorder %s1615_s12, %s1314_s9  ;;  %p1323_p8 = scmp.lt.s32.totalorder %s1314_s9, %s1314_s9 }
  0x4f   : > { %p1317_p4 = pnand %p1315_p11, %p1275_p2  ;;  %p1324_p10 = por %p1323_p8, %p1322_p6 }
  0x51   : > { %p1318_p5 = pneg %p1317_p4 }
  0x53   : > { %p1325_p12 = pnand %p1324_p10, %p1318_p5 }
  0x55   : > { %1328 = shalt.err (!%p1325_p12)
}
  0x56   : > { %1144 = dma.hbm_to_vmem [thread:$0]  (!%p1611_p13), %s2056_s2, 1024, %s1615_s12, [#allocation8], %s1489_s13, %s1489_s13, %s1490_s14  }
  0x57   : > { %s30_s6 = sadd.s32 1, %s1477_s23  ;;  %s33_s10 = sadd.s32 1, %s1481_s24 }
  0x58   : > { %p31_p2 = scmp.ge.s32.totalorder %s30_s6, 4  ;;  %s37_s29 = ssub.s32 1, %s1481_s24 }
  0x59   : > { %s38_s18 = smul.u32 %s1477_s23, %s37_s29  ;;  %s44_s26 = sadd.s32 1, %s1465_s20 }
  0x5a   : > { %s2082_s6 = smov (%p31_p2, %s30_s6), 0  ;;  %s2084_s10 = smov (!%p31_p2, %s33_s10), %s1481_s24 }
  0x5b   : > { %p51_p0 = scmp.ne.s32.totalorder %s1465_s20, %s1461_s19  ;;  %p52_p1 = scmp.eq.s32.totalorder %s1485_s25, 0 }
  0x5c   : > { %p35_p3 = scmp.ge.s32.totalorder %s2084_s10, 2  ;;  %s130_s27 = smul.u32 %s1477_s23, %s1481_s24 }
  0x5d   : > { %p1677_p13 = por %p52_p1, %p51_p0  ;;  %p1155_p7 = scmp.lt.s32.totalorder %s1485_s25, 8 }
  0x5e   : > { %s2086_s10 = smov (%p35_p3, %s2084_s10), 0  ;;  %s201_s13 = sand.u32 1, %s1465_s20  }
  0x5f   : > { %s1028_s14 = sshll.u32 %s38_s18, 11  ;;  %s39_s8 = ssub.s32 1, %s2086_s10 }
  0x60   : > { %s131_s11 = smul.u32 %s2086_s10, %s2082_s6  ;;  %s989_s15 = sshll.u32 %s201_s13, 7 }
  0x61   : > { %s40_s9 = smul.u32 %s39_s8, %s2082_s6  ;;  %s2058_s1 = sadd.s32 1, %s1453_s17 }
  0x62   : > { %s132_s4 = ssub.s32 %s130_s27, %s131_s11  ;;  %s1700_s3 = scalar_lea.hbm %s2021_s0, %s1028_s14 }
  0x63   : > { %s41_s29 = ssub.s32 %s38_s18, %s40_s9  ;;  %p133_p9 = scmp.eq.s32.totalorder %s132_s4, 0 }
  0x64   : > { %p42_p11 = scmp.eq.s32.totalorder %s41_s29, 0  ;;  %s205_s8 = scalar_lea.vmem [#allocation4], %s989_s15 }
  0x65   : > { %s1692_s2 = scalar_select %p133_p9, %s1453_s17, %s2058_s1  }
  0x66   : > { %s1695_s24 = scalar_select %p42_p11, %s1465_s20, %s44_s26  }
  0x67   : > { %s214_s27 = sshll.u32 %s205_s8, 4  ;;  %p1708_p4 = pnand %p1155_p7, %p1677_p13  ;;  %s1702_s27 = int_to_ptr.vmem [resolvable:$true] %s214_s27 }
  0x68   : > { %s1712_s18 = scalar_lea.sflag [#allocation5], %s201_s13  ;;  %s1329_s23 = scalar_lea.hbm %s1700_s3, 2048 }
  0x69   : > { %p1330_p5 = scmp.ne.s32.totalorder %s1700_s3, %s1329_s23  ;;  %p1331_p6 = pneg %p1708_p4 }
  0x6a   : > { %s1334_s12 = scalar_lea.hbm %s2021_s0, 8192  ;;  %p1335_p12 = scmp.lt.u32.totalorder %s1700_s3, %s2021_s0 }
  0x6b   : > { %p1332_p8 = pnand %p1331_p6, %p1330_p5  ;;  %p1336_p2 = scmp.lt.u32.totalorder %s1334_s12, %s1329_s23 }
  0x6c   : > { %p1338_p1 = scmp.lt.u32.totalorder %s1329_s23, %s1700_s3 }
  0x6d   : > { %p1333_p10 = pneg %p1332_p8  ;;  %p1337_p0 = por %p1336_p2, %p1335_p12 }
  0x6f   : > { %p1339_p3 = por %p1338_p1, %p1337_p0 }
  0x71   : > { %p1340_p13 = pnand %p1339_p3, %p1333_p10 }
  0x73   : > { %1343 = shalt.err (!%p1340_p13)
}
  0x74   : > { %s1344_s13 = scalar_lea.vmem %s1702_s27, 2048  ;;  %s1491_s9 = smov [#allocation4]  }
  0x75   : > { %p1345_p7 = scmp.ne.s32.totalorder %s1702_s27, %s1344_s13  ;;  %s1349_s4 = sshll.u32 %s1491_s9, 4  ;;  %s1350_s4 = int_to_ptr.vmem [resolvable:$false] %s1349_s4 }
  0x76   : > { %s1351_s15 = scalar_lea.vmem %s1350_s4, 4096  ;;  %p1352_p5 = scmp.lt.s32.totalorder %s1702_s27, %s1350_s4 }
  0x77   : > { %p1347_p9 = pnand %p1345_p7, %p1331_p6  ;;  %p1353_p8 = scmp.lt.s32.totalorder %s1351_s15, %s1344_s13 }
  0x79   : > { %p1348_p11 = pneg %p1347_p9  ;;  %p1354_p12 = por %p1353_p8, %p1352_p5 }
  0x7b   : > { %p1355_p2 = pnand %p1354_p12, %p1348_p11 }
  0x7d   : > { %1358 = shalt.err (!%p1355_p2)
}
  0x7e   : > { %s1492_s29 = smov 128   ;;  %s1493_s8 = smov 8  }
  0x7f   : > { %1148 = dma.hbm_to_vmem [thread:$0]  (!%p1708_p4), %s1700_s3, 2048, %s1702_s27, %s1712_s18, %s1492_s29, %s1492_s29, %s1493_s8  }
  0x80   : > { %p2060_p6 = scmp.ne.s32.totalorder %s2053_s7, 0 }
  0x81   : > { %s228_s23 = sand.u32 (!%p2060_p6), 1, %s1461_s19   ;;  %p2061_p10 = scmp.ne.s32.totalorder (!%p2060_p6), %s2048_s30, 0 }
  0x82   : > { %226 = sbr.rel (%p2060_p6) target bundleno = 750 (0x2ee), region = 36  ;;  %s993_s5 = sshll.u32 (!%p2060_p6), %s228_s23, 7 }
  0x83   : > { %s229_s26 = scalar_lea.sflag (!%p2060_p6), [#allocation5], %s228_s23  ;;  %s1743_s12 = scalar_lea.vmem (!%p2060_p6), [#allocation4], %s993_s5 }
  0x89   : > { %1432 = dma.done.wait (%p2061_p10), %s229_s26, 2048  }
  0x8a   : > { %1434 = vsyncadd (%p2061_p10), %s229_s26, 4294965248  ;;  %p2062_p0 = scmp.ne.s32.totalorder %s2047_s28, 0 }
  0x8c   : > { %1436 = dma.done.wait (%p2062_p0), [#allocation8], 2048  }
  0x8d   : > { %1438 = vsyncadd (%p2062_p0), [#allocation8], 4294965248  ;;  %s262_s3 = sand.u32 1, %s1449_s16   ;;  %s997_s7 = sshll.u32 %s1469_s21, 7 }
  0x8e   : > { %s996_s27 = sshll.u32 %s262_s3, 7  ;;  %p998_p4 = scmp.ne.s32.totalorder %s1473_s22, 0 }
  0x8f   : > { %s1757_s1 = scalar_lea.vmem [#allocation10], %s996_s27  ;;  %v1255_v0 = vld [vmem:[#allocation7] sm:$0xff] (!%p998_p4)   ;;  %v1256_v1 = vld [vmem:[#allocation7 + $0x8] sm:$0xff] (!%p998_p4)   ;;  %v1257_v2 = vld [vmem:[#allocation7 + $0x10] sm:$0xff] (!%p998_p4)   ;;  %s2063_s18 = sld [smem:[#allocation21_spill]] (!%p998_p4) }
  0x90   : > { %275 = sbr.rel (%p998_p4) target bundleno = 705 (0x2c1), region = 52  ;;  %1062 = vmatprep.subr.bf16.mxu0 (!%p998_p4), %v1255_v0  ;;  %v1258_v3 = vld [vmem:[#allocation7 + $0x18] sm:$0xff] (!%p998_p4)   ;;  %v1761_v4 = vld [vmem:[%s1743_s12] sm:$0xff] (!%p998_p4)  ;;  %v1764_v5 = vld [vmem:[%s1743_s12 + $0x8] sm:$0xff] (!%p998_p4)  ;;  %s1840_s13 = scalar_lea.vmem (!%p998_p4), [#allocation2], %s997_s7 }
  0x91   : > { %1063 = vmatpush3.bf16.msra.mxu0 (!%p998_p4), %v1255_v0  ;;  %v294_v6 = vpack.c.bf16 (!%p998_p4), %v1764_v5, %v1761_v4  ;;  %v1259_v7 = vld [vmem:[#allocation7 + $0x20] sm:$0xff] (!%p998_p4)   ;;  %v1264_v9 = vld [vmem:[#allocation9 + $0x8] sm:$0xff] (!%p998_p4)   ;;  %v1265_v11 = vld [vmem:[#allocation9 + $0x10] sm:$0xff] (!%p998_p4)   ;;  %p1017_p1 = scmp.ne.s32.totalorder (!%p998_p4), %s1469_s21, 0 }
  0x92   : > { %1064 = vmatprep.subr.bf16.mxu0 (!%p998_p4), %v1256_v1  ;;  %v1263_v8 = vld [vmem:[#allocation9] sm:$0xff] (!%p998_p4)   ;;  %v1260_v10 = vld [vmem:[#allocation7 + $0x28] sm:$0xff] (!%p998_p4)   ;;  %v1261_v12 = vld [vmem:[#allocation7 + $0x30] sm:$0xff] (!%p998_p4)  }
  0x93   : > { %1078 = vmatprep.mubr.bf16.mxu0 (!%p998_p4), %v294_v6  ;;  %1094 = vmatprep.subr.bf16.mxu1 (!%p998_p4), %v1263_v8  ;;  %v1266_v13 = vld [vmem:[#allocation9 + $0x18] sm:$0xff] (!%p998_p4)   ;;  %v1267_v15 = vld [vmem:[#allocation9 + $0x20] sm:$0xff] (!%p998_p4)   ;;  %v1769_v16 = vld [vmem:[%s1743_s12 + $0x10] sm:$0xff] (!%p998_p4) }
  0x94   : > { %1095 = vmatpush3.bf16.msra.mxu1 (!%p998_p4), %v1263_v8  ;;  %v1262_v14 = vld [vmem:[#allocation7 + $0x38] sm:$0xff] (!%p998_p4)   ;;  %v1775_v18 = vld [vmem:[%s1743_s12 + $0x20] sm:$0xff] (!%p998_p4)  ;;  %v1778_v19 = vld [vmem:[%s1743_s12 + $0x28] sm:$0xff] (!%p998_p4) }
  0x95   : > { %1065 = vmatpush3.bf16.msra.mxu0 (!%p998_p4), %v1256_v1  ;;  %1096 = vmatprep.subr.bf16.mxu1 (!%p998_p4), %v1264_v9  ;;  %v1772_v17 = vld [vmem:[%s1743_s12 + $0x18] sm:$0xff] (!%p998_p4)  ;;  %v1268_v21 = vld [vmem:[#allocation9 + $0x28] sm:$0xff] (!%p998_p4)   ;;  %v296_v22 = vpack.c.bf16 (!%p998_p4), %v1778_v19, %v1775_v18  ;;  %v1785_v23 = vld [vmem:[%s1743_s12 + $0x30] sm:$0xff] (!%p998_p4) }
  0x96   : > { %1066 = vmatprep.subr.bf16.mxu0 (!%p998_p4), %v1257_v2  ;;  %v295_v20 = vpack.c.bf16 (!%p998_p4), %v1772_v17, %v1769_v16  ;;  %v1788_v24 = vld [vmem:[%s1743_s12 + $0x38] sm:$0xff] (!%p998_p4)  ;;  %v1791_v25 = vld [vmem:[%s1743_s12 + $0x40] sm:$0xff] (!%p998_p4)  ;;  %v1794_v26 = vld [vmem:[%s1743_s12 + $0x48] sm:$0xff] (!%p998_p4) }
  0x97   : > { %v297_v27 = vpack.c.bf16 %v1788_v24, %v1785_v23  ;;  %v298_v28 = vpack.c.bf16 %v1794_v26, %v1791_v25  ;;  %v1801_v29 = vld [vmem:[%s1743_s12 + $0x50] sm:$0xff]  ;;  %v1804_v30 = vld [vmem:[%s1743_s12 + $0x58] sm:$0xff]  ;;  %v1807_v31 = vld [vmem:[%s1743_s12 + $0x60] sm:$0xff] }
  0x98   : > { %1097 = vmatpush3.bf16.msra.mxu1 %v1264_v9  ;;  %v1810_v32 = vld [vmem:[%s1743_s12 + $0x68] sm:$0xff]  ;;  %v299_v33 = vpack.c.bf16 %v1804_v30, %v1801_v29  ;;  %v1817_v35 = vld [vmem:[%s1743_s12 + $0x70] sm:$0xff]  ;;  %v1820_v36 = vld [vmem:[%s1743_s12 + $0x78] sm:$0xff] }
  0x99   : > { %1067 = vmatpush3.bf16.msra.mxu0 %v1257_v2  ;;  %1098 = vmatprep.subr.bf16.mxu1 %v1265_v11  ;;  %v300_v34 = vpack.c.bf16 %v1810_v32, %v1807_v31  ;;  %v301_v37 = vpack.c.bf16 %v1820_v36, %v1817_v35  ;;  %v1269_v38 = vld [vmem:[#allocation9 + $0x30] sm:$0xff]   ;;  %v1270_v39 = vld [vmem:[#allocation9 + $0x38] sm:$0xff]  }
  0x9a   : > { %1068 = vmatprep.subr.bf16.mxu0 %v1258_v3  ;;  %v999_v40 = vld [vmem:[%s2063_s18] ss:$0 sm:$0xff] }
  0x9c   : > { %1099 = vmatpush3.bf16.msra.mxu1 %v1265_v11 }
  0x9d   : > { %1069 = vmatpush3.bf16.msra.mxu0 %v1258_v3  ;;  %1100 = vmatprep.subr.bf16.mxu1 %v1266_v13 }
  0x9e   : > { %1070 = vmatprep.subr.bf16.mxu0 %v1259_v7 }
  0xa0   : > { %1101 = vmatpush3.bf16.msra.mxu1 %v1266_v13 }
  0xa1   : > { %1071 = vmatpush3.bf16.msra.mxu0 %v1259_v7  ;;  %1102 = vmatprep.subr.bf16.mxu1 %v1267_v15 }
  0xa2   : > { %1072 = vmatprep.subr.bf16.mxu0 %v1260_v10 }
  0xa4   : > { %1103 = vmatpush3.bf16.msra.mxu1 %v1267_v15 }
  0xa5   : > { %1073 = vmatpush3.bf16.msra.mxu0 %v1260_v10  ;;  %1104 = vmatprep.subr.bf16.mxu1 %v1268_v21 }
  0xa6   : > { %1074 = vmatprep.subr.bf16.mxu0 %v1261_v12 }
  0xa8   : > { %1105 = vmatpush3.bf16.msra.mxu1 %v1268_v21 }
  0xa9   : > { %1075 = vmatpush3.bf16.msra.mxu0 %v1261_v12  ;;  %1106 = vmatprep.subr.bf16.mxu1 %v1269_v38 }
  0xaa   : > { %1076 = vmatprep.subr.bf16.mxu0 %v1262_v14 }
  0xac   : > { %1107 = vmatpush3.bf16.msra.mxu1 %v1269_v38 }
  0xad   : > { %1077 = vmatpush3.bf16.msra.mxu0 %v1262_v14  ;;  %1108 = vmatprep.subr.bf16.mxu1 %v1270_v39 }
  0xb0   : > { %1079 = vmatmul.mubr.bf16.vlgmr.msra.gmra.mrb[0].mxu0 %v295_v20  ;;  %1109 = vmatpush3.bf16.msra.mxu1 %v1270_v39 }
  0xb1   : > { %1082 = vmatprep.mubr.bf16.mxu0 %v296_v22 }
  0xb8   : > { %1083 = vmatmul.mubr.bf16.gmra.mrb[4].mxu0 %v297_v27 }
  0xb9   : > { %1086 = vmatprep.mubr.bf16.mxu0 %v298_v28 }
  0xc0   : > { %1087 = vmatmul.mubr.bf16.gmra.mrb[8].mxu0 %v299_v33 }
  0xc1   : > { %1090 = vmatprep.mubr.bf16.mxu0 %v300_v34 }
  0xc8   : > { %1091 = vmatmul.mubr.bf16.gmra.mrb[12].mxu0 %v301_v37 }
 0x183   : > { %v1080_v41 = vpop.f32.mrb[0].mxu0 }
 0x184   : > { %v413_v42 = vadd.f32 %v1080_v41, %v999_v40  ;;  %v404_v43 = vpop.f32.mrb[1].mxu0 }
 0x185   : > { %v405_v44 = vadd.f32 %v999_v40, %v404_v43  ;;  %v1081_v45 = vpop.f32.mrb[2].mxu0 }
 0x186   : > { %v416_v46 = vadd.f32 %v1081_v45, %v999_v40  ;;  %v407_v47 = vpop.f32.mrb[3].mxu0  ;;  %v469_v49 = vmax.f32 %v413_v42, 0.0 }
 0x187   : > { %v408_v48 = vadd.f32 %v999_v40, %v407_v47  ;;  %v467_v51 = vmax.f32 %v405_v44, 0.0 }
 0x188   : > { %v470_v50 = vmax.f32 %v416_v46, 0.0 }
 0x189   : > { %v468_v52 = vmax.f32 %v408_v48, 0.0 }
 0x18a   : > { %v484_v53 = vpack.c.bf16 %v470_v50, %v469_v49  ;;  %v1830_v50 = vld [vmem:[%s2063_s18 + $0x1] ss:$0 sm:$0xff] }
 0x18b   : > { %v1084_v54 = vpop.f32.mrb[4].mxu0  ;;  %v483_v55 = vpack.c.bf16 %v468_v52, %v467_v51 }
 0x18c   : > { %v429_v56 = vadd.f32 %v1084_v54, %v999_v40  ;;  %v420_v57 = vpop.f32.mrb[5].mxu0 }
 0x18d   : > { %v421_v58 = vadd.f32 %v999_v40, %v420_v57  ;;  %v1085_v59 = vpop.f32.mrb[6].mxu0  ;;  %1110 = vmatprep.mubr.bf16.mxu1 %v483_v55 }
 0x18e   : > { %v432_v60 = vadd.f32 %v1085_v59, %v999_v40  ;;  %v423_v61 = vpop.f32.mrb[7].mxu0  ;;  %1111 = vmatmul.mubr.bf16.vlgmr.msra.gmra.mrb[0].mxu1 %v484_v53  ;;  %v473_v63 = vmax.f32 %v429_v56, 0.0 }
 0x18f   : > { %v424_v62 = vadd.f32 %v999_v40, %v423_v61  ;;  %v471_v1 = vmax.f32 %v421_v58, 0.0 }
 0x190   : > { %v474_v0 = vmax.f32 %v432_v60, 0.0 }
 0x191   : > { %v472_v2 = vmax.f32 %v424_v62, 0.0 }
 0x192   : > { %v486_v3 = vpack.c.bf16 %v474_v0, %v473_v63 }
 0x193   : > { %v485_v6 = vpack.c.bf16 %v472_v2, %v471_v1  ;;  %v1088_v7 = vpop.f32.mrb[8].mxu0 }
 0x194   : > { %v445_v8 = vadd.f32 %v1088_v7, %v999_v40  ;;  %v436_v9 = vpop.f32.mrb[9].mxu0 }
 0x195   : > { %v437_v10 = vadd.f32 %v999_v40, %v436_v9  ;;  %v1089_v11 = vpop.f32.mrb[10].mxu0  ;;  %1114 = vmatprep.mubr.bf16.mxu1 %v485_v6 }
 0x196   : > { %v448_v12 = vadd.f32 %v1089_v11, %v999_v40  ;;  %v439_v13 = vpop.f32.mrb[11].mxu0  ;;  %1115 = vmatmul.mubr.bf16.gmra.mrb[4].mxu1 %v486_v3  ;;  %v477_v15 = vmax.f32 %v445_v8, 0.0 }
 0x197   : > { %v440_v14 = vadd.f32 %v999_v40, %v439_v13  ;;  %v475_v21 = vmax.f32 %v437_v10, 0.0 }
 0x198   : > { %v478_v20 = vmax.f32 %v448_v12, 0.0 }
 0x199   : > { %v476_v22 = vmax.f32 %v440_v14, 0.0 }
 0x19a   : > { %v488_v27 = vpack.c.bf16 %v478_v20, %v477_v15 }
 0x19b   : > { %v487_v28 = vpack.c.bf16 %v476_v22, %v475_v21  ;;  %v1092_v33 = vpop.f32.mrb[12].mxu0 }
 0x19c   : > { %v461_v34 = vadd.f32 %v1092_v33, %v999_v40  ;;  %v452_v37 = vpop.f32.mrb[13].mxu0 }
 0x19d   : > { %v453_v38 = vadd.f32 %v999_v40, %v452_v37  ;;  %v1093_v39 = vpop.f32.mrb[14].mxu0  ;;  %1118 = vmatprep.mubr.bf16.mxu1 %v487_v28 }
 0x19e   : > { %v464_v41 = vadd.f32 %v1093_v39, %v999_v40  ;;  %v455_v42 = vpop.f32.mrb[15].mxu0  ;;  %1119 = vmatmul.mubr.bf16.gmra.mrb[8].mxu1 %v488_v27  ;;  %v481_v44 = vmax.f32 %v461_v34, 0.0 }
 0x19f   : > { %v456_v43 = vadd.f32 %v999_v40, %v455_v42  ;;  %v479_v46 = vmax.f32 %v453_v38, 0.0 }
 0x1a0   : > { %v482_v45 = vmax.f32 %v464_v41, 0.0 }
 0x1a1   : > { %v480_v47 = vmax.f32 %v456_v43, 0.0 }
 0x1a2   : > { %v490_v48 = vpack.c.bf16 %v482_v45, %v481_v44 }
 0x1a3   : > { %v489_v49 = vpack.c.bf16 %v480_v47, %v479_v46 }
 0x1a5   : > { %1122 = vmatprep.mubr.bf16.mxu1 %v489_v49 }
 0x1a6   : > { %1123 = vmatmul.mubr.bf16.gmra.mrb[12].mxu1 %v490_v48 }
 0x261   : > { %v1112_v51 = vpop.f32.mrb[0].mxu1 }
 0x262   : > { %v602_v52 = vadd.f32 %v1112_v51, %v1830_v50  ;;  %v593_v53 = vpop.f32.mrb[1].mxu1 }
 0x263   : > { %v594_v40 = vadd.f32 %v1830_v50, %v593_v53  ;;  %v1113_v54 = vpop.f32.mrb[2].mxu1 }
 0x264   : > { %v658_v55 = vadd.f32 %v602_v52, %v1769_v16  ;;  %v605_v56 = vadd.f32 %v1113_v54, %v1830_v50  ;;  %v596_v57 = vpop.f32.mrb[3].mxu1 }
 0x265   : > { %v656_v58 = vadd.f32 %v594_v40, %v1761_v4  ;;  %v597_v59 = vadd.f32 %v1830_v50, %v596_v57 }
 0x266   : > { %675 = vst [vmem:[%s1840_s13 + $0x10] sm:$0xff] %v658_v55  ;;  %v659_v60 = vadd.f32 %v605_v56, %v1772_v17  ;;  %v712_v2 = vmul.f32 %v658_v55, %v658_v55 }
 0x267   : > { %673 = vst [vmem:[%s1840_s13] sm:$0xff] %v656_v58  ;;  %v657_v16 = vadd.f32 %v597_v59, %v1764_v5  ;;  %v710_v61 = vmul.f32 %v656_v58, %v656_v58 }
 0x268   : > { %676 = vst [vmem:[%s1840_s13 + $0x18] sm:$0xff] %v659_v60  ;;  %v713_v8 = vmul.f32 %v659_v60, %v659_v60 }
 0x269   : > { %674 = vst [vmem:[%s1840_s13 + $0x8] sm:$0xff] %v657_v16  ;;  %v689_v62 = vadd.f32 %v657_v16, %v656_v58  ;;  %v711_v4 = vmul.f32 %v657_v16, %v657_v16  ;;  %v1116_v63 = vpop.f32.mrb[4].mxu1 }
 0x26a   : > { %v618_v0 = vadd.f32 %v1116_v63, %v1830_v50  ;;  %v609_v1 = vpop.f32.mrb[5].mxu1 }
 0x26b   : > { %v690_v3 = vadd.f32 %v689_v62, %v658_v55  ;;  %v726_v6 = vadd.f32 %v711_v4, %v710_v61  ;;  %v610_v7 = vadd.f32 %v1830_v50, %v609_v1  ;;  %v1117_v17 = vpop.f32.mrb[6].mxu1 }
 0x26c   : > { %v662_v5 = vadd.f32 %v618_v0, %v1785_v23  ;;  %v621_v9 = vadd.f32 %v1117_v17, %v1830_v50  ;;  %v612_v10 = vpop.f32.mrb[7].mxu1 }
 0x26d   : > { %v727_v11 = vadd.f32 %v726_v6, %v712_v2  ;;  %v660_v12 = vadd.f32 %v610_v7, %v1775_v18  ;;  %v691_v13 = vadd.f32 %v690_v3, %v659_v60  ;;  %v613_v14 = vadd.f32 %v1830_v50, %v612_v10 }
 0x26e   : > { %679 = vst [vmem:[%s1840_s13 + $0x30] sm:$0xff] %v662_v5  ;;  %v663_v15 = vadd.f32 %v621_v9, %v1788_v24  ;;  %v716_v38 = vmul.f32 %v662_v5, %v662_v5 }
 0x26f   : > { %677 = vst [vmem:[%s1840_s13 + $0x20] sm:$0xff] %v660_v12  ;;  %v692_v20 = vadd.f32 %v691_v13, %v660_v12  ;;  %v714_v21 = vmul.f32 %v660_v12, %v660_v12  ;;  %v728_v22 = vadd.f32 %v727_v11, %v713_v8  ;;  %v661_v27 = vadd.f32 %v613_v14, %v1778_v19 }
 0x270   : > { %680 = vst [vmem:[%s1840_s13 + $0x38] sm:$0xff] %v663_v15  ;;  %v717_v43 = vmul.f32 %v663_v15, %v663_v15 }
 0x271   : > { %v729_v23 = vadd.f32 %v728_v22, %v714_v21  ;;  %678 = vst [vmem:[%s1840_s13 + $0x28] sm:$0xff] %v661_v27  ;;  %v693_v28 = vadd.f32 %v692_v20, %v661_v27  ;;  %v715_v33 = vmul.f32 %v661_v27, %v661_v27  ;;  %v1120_v34 = vpop.f32.mrb[8].mxu1 }
 0x272   : > { %v634_v18 = vadd.f32 %v1120_v34, %v1830_v50  ;;  %v625_v37 = vpop.f32.mrb[9].mxu1 }
 0x273   : > { %v694_v39 = vadd.f32 %v693_v28, %v662_v5  ;;  %v730_v24 = vadd.f32 %v729_v23, %v715_v33  ;;  %v626_v41 = vadd.f32 %v1830_v50, %v625_v37  ;;  %v1121_v42 = vpop.f32.mrb[10].mxu1 }
 0x274   : > { %v666_v19 = vadd.f32 %v634_v18, %v1801_v29  ;;  %v637_v44 = vadd.f32 %v1121_v42, %v1830_v50  ;;  %v628_v45 = vpop.f32.mrb[11].mxu1 }
 0x275   : > { %v731_v46 = vadd.f32 %v730_v24, %v716_v38  ;;  %v664_v47 = vadd.f32 %v626_v41, %v1791_v25  ;;  %v695_v48 = vadd.f32 %v694_v39, %v663_v15  ;;  %v629_v49 = vadd.f32 %v1830_v50, %v628_v45 }
 0x276   : > { %683 = vst [vmem:[%s1840_s13 + $0x50] sm:$0xff] %v666_v19  ;;  %v667_v51 = vadd.f32 %v637_v44, %v1804_v30  ;;  %v720_v59 = vmul.f32 %v666_v19, %v666_v19 }
 0x277   : > { %681 = vst [vmem:[%s1840_s13 + $0x40] sm:$0xff] %v664_v47  ;;  %v696_v52 = vadd.f32 %v695_v48, %v664_v47  ;;  %v718_v53 = vmul.f32 %v664_v47, %v664_v47  ;;  %v732_v40 = vadd.f32 %v731_v46, %v717_v43  ;;  %v665_v54 = vadd.f32 %v629_v49, %v1794_v26 }
 0x278   : > { %684 = vst [vmem:[%s1840_s13 + $0x58] sm:$0xff] %v667_v51  ;;  %v721_v62 = vmul.f32 %v667_v51, %v667_v51 }
 0x279   : > { %v733_v29 = vadd.f32 %v732_v40, %v718_v53  ;;  %682 = vst [vmem:[%s1840_s13 + $0x48] sm:$0xff] %v665_v54  ;;  %v697_v55 = vadd.f32 %v696_v52, %v665_v54  ;;  %v719_v56 = vmul.f32 %v665_v54, %v665_v54  ;;  %v1124_v57 = vpop.f32.mrb[12].mxu1 }
 0x27a   : > { %v650_v25 = vadd.f32 %v1124_v57, %v1830_v50  ;;  %v641_v58 = vpop.f32.mrb[13].mxu1 }
 0x27b   : > { %v698_v60 = vadd.f32 %v697_v55, %v666_v19  ;;  %v734_v30 = vadd.f32 %v733_v29, %v719_v56  ;;  %v642_v16 = vadd.f32 %v1830_v50, %v641_v58  ;;  %v1125_v61 = vpop.f32.mrb[14].mxu1 }
 0x27c   : > { %v670_v26 = vadd.f32 %v650_v25, %v1817_v35  ;;  %v653_v4 = vadd.f32 %v1125_v61, %v1830_v50  ;;  %v644_v63 = vpop.f32.mrb[15].mxu1 }
 0x27d   : > { %v735_v0 = vadd.f32 %v734_v30, %v720_v59  ;;  %v668_v1 = vadd.f32 %v642_v16, %v1807_v31  ;;  %v699_v2 = vadd.f32 %v698_v60, %v667_v51  ;;  %v645_v3 = vadd.f32 %v1830_v50, %v644_v63 }
 0x27e   : > { %687 = vst [vmem:[%s1840_s13 + $0x70] sm:$0xff] %v670_v26  ;;  %v671_v6 = vadd.f32 %v653_v4, %v1820_v36  ;;  %v724_v11 = vmul.f32 %v670_v26, %v670_v26 }
 0x27f   : > { %685 = vst [vmem:[%s1840_s13 + $0x60] sm:$0xff] %v668_v1  ;;  %v700_v7 = vadd.f32 %v699_v2, %v668_v1  ;;  %v722_v17 = vmul.f32 %v668_v1, %v668_v1  ;;  %v736_v8 = vadd.f32 %v735_v0, %v721_v62  ;;  %v669_v5 = vadd.f32 %v645_v3, %v1810_v32 }
 0x280   : > { %688 = vst [vmem:[%s1840_s13 + $0x78] sm:$0xff] %v671_v6  ;;  %v725_v13 = vmul.f32 %v671_v6, %v671_v6 }
 0x281   : > { %v737_v35 = vadd.f32 %v736_v8, %v722_v17  ;;  %686 = vst [vmem:[%s1840_s13 + $0x68] sm:$0xff] %v669_v5  ;;  %v701_v9 = vadd.f32 %v700_v7, %v669_v5  ;;  %v723_v10 = vmul.f32 %v669_v5, %v669_v5 }
 0x283   : > { %v702_v12 = vadd.f32 %v701_v9, %v670_v26  ;;  %v738_v31 = vadd.f32 %v737_v35, %v723_v10 }
 0x285   : > { %v703_v14 = vadd.f32 %v702_v12, %v671_v6  ;;  %v739_v50 = vadd.f32 %v738_v31, %v724_v11 }
 0x287   : > { %v704_v15 = vrot.slane %v703_v14, 4  ;;  %v740_v20 = vadd.f32 %v739_v50, %v725_v13 }
 0x289   : > { %v705_v36 = vadd.f32 %v704_v15, %v703_v14  ;;  %v741_v21 = vrot.slane %v740_v20, 4 }
 0x28b   : > { %v706_v22 = vrot.slane %v705_v36, 2  ;;  %v742_v27 = vadd.f32 %v741_v21, %v740_v20 }
 0x28d   : > { %v707_v23 = vadd.f32 %v706_v22, %v705_v36  ;;  %v743_v28 = vrot.slane %v742_v27, 2  ;;  %750 = sbr.rel (%p1017_p1) target bundleno = 662 (0x296), region = 56 }
 0x28f   : > { %v708_v32 = vrot.slane %v707_v23, 1  ;;  %v744_v33 = vadd.f32 %v743_v28, %v742_v27 }
 0x291   : > { %v709_v34 = vadd.f32 %v708_v32, %v707_v23  ;;  %v745_v18 = vrot.slane %v744_v33, 1 }
 0x293   : > { %v746_v37 = vadd.f32 %v745_v18, %v744_v33  ;;  %751 = vst [vmem:[#allocation3] sm:$0x1] (!%p1017_p1), %v709_v34 }
 0x295   : > { %752 = vst [vmem:[#allocation3 + $0x1] sm:$0x1] %v746_v37 }
 0x296 PF: > { %p1018_p3 = scmp.eq.s32.totalorder %s1469_s21, 0 }
 0x298   : > { %756 = sbr.rel (%p1018_p3) target bundleno = 672 (0x2a0), region = 60 }
 0x29c   : > { %v757_v38 = vld [vmem:[#allocation3] sm:$0x1] (!%p1018_p3)  ;;  %v760_v39 = vld [vmem:[#allocation3 + $0x1] sm:$0x1] (!%p1018_p3) }
 0x29d   : > { %v758_v24 = vadd.f32 (!%p1018_p3), %v757_v38, %v709_v34  ;;  %v761_v41 = vadd.f32 (!%p1018_p3), %v760_v39, %v746_v37 }
 0x29f   : > { %759 = vst [vmem:[#allocation3] sm:$0x1] %v758_v24  ;;  %762 = vst [vmem:[#allocation3 + $0x1] sm:$0x1] %v761_v41 }
 0x2a0 PF: > { %p1019_p13 = scmp.ne.s32.totalorder %s1469_s21, 3 }
 0x2a1   : > { %s2064_s15 = sld [smem:[#allocation21_spill]] (!%p1019_p13) }
 0x2a2   : > { %766 = sbr.rel (%p1019_p13) target bundleno = 705 (0x2c1), region = 64 }
 0x2a6   : > { %v767_v42 = vld [vmem:[#allocation3] sm:$0x1] (!%p1019_p13)  ;;  %v769_v43 = vld [vmem:[#allocation3 + $0x1] sm:$0x1] (!%p1019_p13) }
 0x2a7   : > { %v768_v19 = vmul.f32 (!%p1019_p13), 0.001953125, %v767_v42  ;;  %v770_v44 = vmul.f32 (!%p1019_p13), 0.001953125, %v769_v43  ;;  %v773_v48 = vld [vmem:[%s2064_s15 + $0x2] sm:$0x1] (!%p1019_p13)  ;;  %v777_v52 = vld [vmem:[%s2064_s15 + $0x3] sm:$0x1] (!%p1019_p13) }
 0x2a9   : > { %v771_v45 = vmul.f32 %v768_v19, %v768_v19 }
 0x2ab   : > { %v772_v46 = vsub.f32 %v770_v44, %v771_v45 }
 0x2ad   : > { %v774_v47 = vadd.f32 1e-05, %v772_v46 }
 0x2af   : > { %1271 = vrsqrt.f32 %v774_v47 }
 0x2b9   : > { %v1272_v49 = vpop.eup %1271 }
 0x2ba   : > { %v776_v51 = vmul.f32 %v1272_v49, %v773_v48 }
 0x2bc   : > { %780 = vst [vmem:[#allocation3] sm:$0x1] %v776_v51  ;;  %v778_v53 = vmul.f32 %v776_v51, %v768_v19 }
 0x2be   : > { %v779_v40 = vsub.f32 %v777_v52, %v778_v53 }
 0x2c0   : > { %781 = vst [vmem:[#allocation3 + $0x1] sm:$0x1] %v779_v40 }
 0x2c1 PF: > { %p1020_p7 = scmp.ne.s32.totalorder %s1473_s22, 1 }
 0x2c2   : > { %s1898_s23 = scalar_lea.vmem (!%p1020_p7), [#allocation2], %s997_s7 }
 0x2c3   : > { %785 = sbr.rel (%p1020_p7) target bundleno = 722 (0x2d2), region = 68  ;;  %v1021_v54 = vld [vmem:[#allocation3] ss:$0 sm:$0xff] (!%p1020_p7)  ;;  %v788_v56 = vld [vmem:[%s1898_s23 + $0x8] sm:$0xff] (!%p1020_p7)  ;;  %v789_v57 = vld [vmem:[%s1898_s23 + $0x10] sm:$0xff] (!%p1020_p7) }
 0x2c4   : > { %v787_v55 = vld [vmem:[%s1898_s23] sm:$0xff] (!%p1020_p7)  ;;  %v809_v58 = vmul.f32 (!%p1020_p7), %v1021_v54, %v788_v56  ;;  %v810_v59 = vmul.f32 (!%p1020_p7), %v1021_v54, %v789_v57  ;;  %v790_v60 = vld [vmem:[%s1898_s23 + $0x18] sm:$0xff] (!%p1020_p7)  ;;  %v792_v16 = vld [vmem:[%s1898_s23 + $0x28] sm:$0xff] (!%p1020_p7) }
 0x2c5   : > { %v808_v25 = vmul.f32 (!%p1020_p7), %v1021_v54, %v787_v55  ;;  %v791_v30 = vld [vmem:[%s1898_s23 + $0x20] sm:$0xff] (!%p1020_p7)  ;;  %v811_v61 = vmul.f32 (!%p1020_p7), %v1021_v54, %v790_v60  ;;  %v813_v26 = vmul.f32 (!%p1020_p7), %v1021_v54, %v792_v16  ;;  %v793_v4 = vld [vmem:[%s1898_s23 + $0x30] sm:$0xff] (!%p1020_p7)  ;;  %v794_v63 = vld [vmem:[%s1898_s23 + $0x38] sm:$0xff] (!%p1020_p7) }
 0x2c6   : > { %v812_v62 = vmul.f32 (!%p1020_p7), %v1021_v54, %v791_v30  ;;  %v795_v0 = vld [vmem:[%s1898_s23 + $0x40] sm:$0xff] (!%p1020_p7)  ;;  %v814_v6 = vmul.f32 (!%p1020_p7), %v1021_v54, %v793_v4  ;;  %v796_v7 = vld [vmem:[%s1898_s23 + $0x48] sm:$0xff] (!%p1020_p7)  ;;  %v797_v17 = vld [vmem:[%s1898_s23 + $0x50] sm:$0xff] (!%p1020_p7)  ;;  %v815_v10 = vmul.f32 (!%p1020_p7), %v1021_v54, %v794_v63 }
 0x2c7   : > { %v1894_v29 = vld [vmem:[#allocation3 + $0x1] ss:$0 sm:$0xff] (!%p1020_p7)  ;;  %v798_v8 = vld [vmem:[%s1898_s23 + $0x58] sm:$0xff] (!%p1020_p7)  ;;  %v800_v12 = vld [vmem:[%s1898_s23 + $0x68] sm:$0xff] (!%p1020_p7)  ;;  %v816_v14 = vmul.f32 (!%p1020_p7), %v1021_v54, %v795_v0  ;;  %v817_v50 = vmul.f32 (!%p1020_p7), %v1021_v54, %v796_v7  ;;  %v818_v15 = vmul.f32 (!%p1020_p7), %v1021_v54, %v797_v17 }
 0x2c8   : > { %v829_v1 = vadd.f32 (!%p1020_p7), %v1894_v29, %v808_v25  ;;  %v830_v2 = vadd.f32 (!%p1020_p7), %v1894_v29, %v809_v58  ;;  %v831_v3 = vadd.f32 (!%p1020_p7), %v1894_v29, %v810_v59  ;;  %v832_v5 = vadd.f32 (!%p1020_p7), %v1894_v29, %v811_v61  ;;  %v799_v11 = vld [vmem:[%s1898_s23 + $0x60] sm:$0xff] (!%p1020_p7)  ;;  %v801_v31 = vld [vmem:[%s1898_s23 + $0x70] sm:$0xff] (!%p1020_p7)  ;;  %v802_v20 = vld [vmem:[%s1898_s23 + $0x78] sm:$0xff] (!%p1020_p7) }
 0x2c9   : > { %v833_v35 = vadd.f32 (!%p1020_p7), %v1894_v29, %v812_v62  ;;  %v834_v9 = vadd.f32 (!%p1020_p7), %v1894_v29, %v813_v26  ;;  %v835_v13 = vadd.f32 (!%p1020_p7), %v1894_v29, %v814_v6  ;;  %v836_v36 = vadd.f32 (!%p1020_p7), %v1894_v29, %v815_v10 }
 0x2ca   : > { %845 = vst [vmem:[%s1757_s1] sm:$0xff] %v829_v1  ;;  %846 = vst [vmem:[%s1757_s1 + $0x8] sm:$0xff] %v830_v2  ;;  %v819_v21 = vmul.f32 %v1021_v54, %v798_v8  ;;  %v820_v22 = vmul.f32 %v1021_v54, %v799_v11  ;;  %v821_v27 = vmul.f32 %v1021_v54, %v800_v12 }
 0x2cb   : > { %847 = vst [vmem:[%s1757_s1 + $0x10] sm:$0xff] %v831_v3  ;;  %848 = vst [vmem:[%s1757_s1 + $0x18] sm:$0xff] %v832_v5  ;;  %v837_v23 = vadd.f32 %v1894_v29, %v816_v14  ;;  %v838_v28 = vadd.f32 %v1894_v29, %v817_v50  ;;  %v839_v32 = vadd.f32 %v1894_v29, %v818_v15 }
 0x2cc   : > { %849 = vst [vmem:[%s1757_s1 + $0x20] sm:$0xff] %v833_v35  ;;  %850 = vst [vmem:[%s1757_s1 + $0x28] sm:$0xff] %v834_v9  ;;  %v822_v33 = vmul.f32 %v1021_v54, %v801_v31  ;;  %v840_v34 = vadd.f32 %v1894_v29, %v819_v21  ;;  %v841_v18 = vadd.f32 %v1894_v29, %v820_v22 }
 0x2cd   : > { %851 = vst [vmem:[%s1757_s1 + $0x30] sm:$0xff] %v835_v13  ;;  %852 = vst [vmem:[%s1757_s1 + $0x38] sm:$0xff] %v836_v36  ;;  %v842_v37 = vadd.f32 %v1894_v29, %v821_v27  ;;  %v823_v38 = vmul.f32 %v1021_v54, %v802_v20 }
 0x2ce   : > { %853 = vst [vmem:[%s1757_s1 + $0x40] sm:$0xff] %v837_v23  ;;  %854 = vst [vmem:[%s1757_s1 + $0x48] sm:$0xff] %v838_v28  ;;  %v843_v39 = vadd.f32 %v1894_v29, %v822_v33 }
 0x2cf   : > { %855 = vst [vmem:[%s1757_s1 + $0x50] sm:$0xff] %v839_v32  ;;  %856 = vst [vmem:[%s1757_s1 + $0x58] sm:$0xff] %v840_v34  ;;  %v844_v24 = vadd.f32 %v1894_v29, %v823_v38 }
 0x2d0   : > { %857 = vst [vmem:[%s1757_s1 + $0x60] sm:$0xff] %v841_v18  ;;  %858 = vst [vmem:[%s1757_s1 + $0x68] sm:$0xff] %v842_v37 }
 0x2d1   : > { %859 = vst [vmem:[%s1757_s1 + $0x70] sm:$0xff] %v843_v39  ;;  %860 = vst [vmem:[%s1757_s1 + $0x78] sm:$0xff] %v844_v24 }
 0x2d2 PF: > { %s2065_s5 = sld [smem:[#allocation17_spill]]  ;;  %s869_s26 = smul.u32 %s1469_s21, %s1473_s22 }
 0x2d3   : > { %s876_s12 = sshll.u32 %s1757_s1, 4  ;;  %s2066_s30 = sld [smem:[#allocation22_spill]]  ;;  %s1951_s12 = int_to_ptr.vmem [resolvable:$true] %s876_s12 }
 0x2d4   : > { %s1029_s7 = sshll.u32 %s869_s26, 11  ;;  %s1960_s14 = scalar_lea.sflag [#allocation6], %s262_s3 }
 0x2d5   : > { %s1359_s11 = scalar_lea.vmem %s1951_s12, 2048  ;;  %s1494_s21 = smov [#allocation10]  }
 0x2d6   : > { %p1360_p9 = scmp.ne.s32.totalorder %s1951_s12, %s1359_s11  ;;  %s1363_s22 = sshll.u32 %s1494_s21, 4  ;;  %s1364_s22 = int_to_ptr.vmem [resolvable:$false] %s1363_s22 }
 0x2d7   : > { %s1365_s1 = scalar_lea.vmem %s1364_s22, 4096  ;;  %p1366_p12 = scmp.lt.s32.totalorder %s1951_s12, %s1364_s22 }
 0x2d8   : > { %p2067_p11 = scmp.ne.s32.totalorder %s2065_s5, 0  ;;  %p1367_p2 = scmp.lt.s32.totalorder %s1365_s1, %s1359_s11 }
 0x2d9   : > { %s1956_s18 = scalar_lea.hbm %s2066_s30, %s1029_s7 }
 0x2da   : > { %p1361_p5 = pnand %p1360_p9, %p2067_p11  ;;  %p1368_p6 = por %p1367_p2, %p1366_p12 }
 0x2dc   : > { %p1362_p8 = pneg %p1361_p5 }
 0x2de   : > { %p1369_p10 = pnand %p1368_p6, %p1362_p8 }
 0x2e0   : > { %1372 = shalt.err (!%p1369_p10)
}
 0x2e1   : > { %s1373_s3 = scalar_lea.hbm %s1956_s18, 2048  ;;  %s1377_s4 = scalar_lea.hbm %s2066_s30, 8192 }
 0x2e2   : > { %p1374_p0 = scmp.ne.s32.totalorder %s1956_s18, %s1373_s3  ;;  %p1378_p3 = scmp.lt.u32.totalorder %s1956_s18, %s2066_s30 }
 0x2e3   : > { %p1379_p13 = scmp.lt.u32.totalorder %s1377_s4, %s1373_s3  ;;  %p1381_p9 = scmp.lt.u32.totalorder %s1373_s3, %s1956_s18 }
 0x2e4   : > { %p1375_p4 = pnand %p1374_p0, %p2067_p11 }
 0x2e5   : > { %p1380_p7 = por %p1379_p13, %p1378_p3 }
 0x2e6   : > { %p1376_p1 = pneg %p1375_p4 }
 0x2e7   : > { %p1382_p5 = por %p1381_p9, %p1380_p7 }
 0x2e9   : > { %p1383_p8 = pnand %p1382_p5, %p1376_p1 }
 0x2eb   : > { %1386 = shalt.err (!%p1383_p8)
}
 0x2ec   : > { %s1495_s8 = smov 128   ;;  %s1496_s23 = smov 8  }
 0x2ed   : > { %1136 = dma.vmem_to_hbm [thread:$0]  (%p2067_p11), %s1951_s12, 2048, %s1956_s18, %s1960_s14, %s1495_s8, %s1495_s8, %s1496_s23  }
 0x2ee PF: > { %s2068_s26 = sld [smem:[#allocation14_spill]]  ;;  %s2069_s7 = sld [smem:[#allocation18_spill]] }
 0x2ef   : > { %p1158_p12 = scmp.ge.s32.totalorder %s1485_s25, 2 }
 0x2f4   : > { %s891_s27 = sand.u32 1, %s2068_s26   ;;  %p2070_p2 = scmp.ne.s32.totalorder %s2069_s7, 0 }
 0x2f5   : > { %s892_s28 = scalar_lea.sflag [#allocation6], %s891_s27 }
 0x2f6   : > { %p1150_p6 = pnand %p1158_p12, %p2070_p2 }
 0x2f8   : > { %1440 = dma.done.wait (!%p1150_p6), %s892_s28, 2048  }
 0x2f9   : > { %1442 = vsyncadd (!%p1150_p6), %s892_s28, 4294965248  ;;  %s21_s25 = sadd.s32 1, %s1485_s25   ;;  %s2071_s21 = sld [smem:[#allocation15_spill]] }
 0x2fa   : > { %p18_p10 = scmp.ge.s32.totalorder %s21_s25, 10   ;;  %s2072_s22 = sld [smem:[#allocation16_spill]] }
 0x2fb   : > { %s2073_s15 = smov %s1449_s16  ;;  %s2074_s16 = smov %s1453_s17 }
 0x2fc   : > { %s2075_s17 = smov %s1692_s2  ;;  %s2076_s18 = smov %s1461_s19 }
 0x2fd   : > { %s2077_s19 = smov %s1465_s20  ;;  %s2078_s20 = smov %s1695_s24 }
 0x2fe   : > { %s2079_s23 = smov %s2082_s6  ;;  %s2080_s24 = smov %s2086_s10 }
 0x2ff   :  { %20 = sbr.rel (!%p18_p10) target bundleno = 15 (0xf), region = 111 }
 0x306   :  { %897 = vsyncpa [#allocation5], 1 }
 0x307   :  { %899 = vsyncpa [#allocation5 + $0x1], 1 }
 0x308   :  { %900 = vsyncpa [#allocation8], 1 }
 0x309   :  { %901 = vsyncpa [#allocation6], 1 }
 0x30a   :  { %903 = vsyncpa [#allocation6 + $0x1], 1 }

</bundles_post_ra>
